<compile_context>
chip_gen: v6e
topology: v6e:2x2x1
jax: 0.10.0
libtpu: 0.0.40
codegen_flags: <defaults>
</compile_context>

<pallas_src>
import jax
import jax.numpy as jnp
from jax.experimental import pallas as pl
from jax.experimental.pallas import tpu as pltpu

EPS = 1e-6


def _vmem_budget():
    """Generation-aware (scoped VMEM limit, per-block budget)."""
    cap = 128 * 1024 * 1024
    try:
        info = pltpu.get_tpu_info()
        cap = int(getattr(info, "vmem_capacity_bytes", cap)) or cap
    except Exception:
        pass
    # Leave headroom below physical VMEM (v5e/v6e: 128 MiB -> 96; v7x: 64 -> 48).
    vmem_limit = min((cap * 3) // 4, 100 * 1024 * 1024)
    # Normalize pass streams 2 big blocks (x in, out), each double-buffered
    # -> 4 resident big buffers; target ~2/3 of the scoped limit for them.
    block_budget = max(2 * 1024 * 1024, vmem_limit // 6)
    return vmem_limit, block_budget


def _choose_c_tile(C, hw, itemsize, block_budget):
    """Largest 8-aligned channel tile whose (c_tile, HW) block fits the budget.

    The channel grid uses pl.cdiv, so c_tile need not divide C; the final
    (padded) block is safe because the reduction is along HW and out-of-bounds
    channel rows are discarded on writeback.
    """
    if C * hw * itemsize <= block_budget:
        return C                                  # whole channel dim, one block
    ct = (block_budget // (hw * itemsize)) // 8 * 8
    return int(max(8, min(ct, C)))


# --------------------------------------------------------------------------
# Kernels
# --------------------------------------------------------------------------

def _stats_kernel(x_ref, mu_ref, sig_ref):
    # x_ref: (1, c_tile, HW). Mean + centered two-pass unbiased variance (f32).
    hw = x_ref.shape[-1]
    inv_n = 1.0 / hw
    inv_nm1 = 1.0 / max(hw - 1, 1)                # torch.var default: unbiased
    x = x_ref[...].astype(jnp.float32)
    mu = jnp.sum(x, axis=-1, keepdims=True) * inv_n
    d = x - mu
    var = jnp.sum(d * d, axis=-1, keepdims=True) * inv_nm1
    mu_ref[...] = mu
    sig_ref[...] = jnp.sqrt(var + EPS)


def _normalize_kernel(x_ref, a_ref, b_ref, o_ref):
    # out = x * a + b with per-channel a, b (normalize + restyle pre-folded).
    # For sub-f32 inputs keep the elementwise path in the input dtype
    # (halves vreg pressure / VMEM on v6e/v7x); stats stay f32 upstream.
    cdt = jnp.float32 if o_ref.dtype == jnp.float32 else o_ref.dtype
    a = a_ref[...].astype(cdt)                    # (1, c_tile, 1)
    b = b_ref[...].astype(cdt)                    # (1, c_tile, 1)
    o_ref[...] = (x_ref[...].astype(cdt) * a + b).astype(o_ref.dtype)


def _fused_kernel(perm_ref, x_ref, o_ref, mu_s, sig_s, inv_s):
    # Whole x resident in VMEM: read HBM once, write once.
    nb, _, hw = x_ref.shape
    inv_n = 1.0 / hw
    inv_nm1 = 1.0 / max(hw - 1, 1)
    unroll = nb <= 8

    def stats_body(b, carry):
        xb = x_ref[b].astype(jnp.float32)                     # (C, HW)
        mu = jnp.sum(xb, axis=-1, keepdims=True) * inv_n
        d = xb - mu
        var = jnp.sum(d * d, axis=-1, keepdims=True) * inv_nm1
        mu_s[b] = mu
        sig_s[b] = jnp.sqrt(var + EPS)
        inv_s[b] = jax.lax.rsqrt(var + EPS)
        return carry

    def style_body(b, carry):
        pb = perm_ref[b]                                      # permuted index
        a = sig_s[pb] * inv_s[b]                              # (C, 1)
        bias = mu_s[pb] - mu_s[b] * a                         # (C, 1)
        xb = x_ref[b].astype(jnp.float32)                     # (C, HW)
        o_ref[b] = (xb * a + bias).astype(o_ref.dtype)
        return carry

    jax.lax.fori_loop(0, nb, stats_body, 0, unroll=unroll)
    jax.lax.fori_loop(0, nb, style_body, 0, unroll=unroll)


# --------------------------------------------------------------------------
# Wrapper
# --------------------------------------------------------------------------

def adain_pallas(x, perm, *, force_streaming=False):
    """AdaIN forward (training path, style-mix applied).

    Args:
      x:    (B, C, H, W) array.
      perm: (B,) int32 permutation of batch indices.
    Returns:
      (B, C, H, W) array, same dtype as x.
    """
    B, C, H, W = x.shape
    HW = H * W
    x_flat = x.reshape(B, C, HW)
    itemsize = x.dtype.itemsize
    vmem_limit, block_budget = _vmem_budget()

    # ---- fused single-pass path (x fits in VMEM with headroom) ------------
    x_bytes = B * C * HW * itemsize
    slab_f32 = C * HW * 4                          # per-batch f32 temporaries
    c_pad = max(8, -(-C // 8) * 8)
    scratch_bytes = 3 * B * c_pad * 128 * 4        # (B, C, 1) f32 pads lanes->128
    fused_need = 4 * x_bytes + 2 * slab_f32 + scratch_bytes
    use_fused = (not force_streaming) and fused_need <= (vmem_limit * 4) // 5

    if use_fused:
        out_flat = pl.pallas_call(
            _fused_kernel,
            out_shape=jax.ShapeDtypeStruct((B, C, HW), x.dtype),
            grid_spec=pltpu.PrefetchScalarGridSpec(
                num_scalar_prefetch=1,
                grid=(1,),
                in_specs=[pl.BlockSpec((B, C, HW), lambda i, perm_ref: (0, 0, 0))],
                out_specs=pl.BlockSpec((B, C, HW), lambda i, perm_ref: (0, 0, 0)),
                scratch_shapes=[pltpu.VMEM((B, C, 1), jnp.float32)] * 3,
            ),
            compiler_params=pltpu.CompilerParams(
                dimension_semantics=("arbitrary",),
                vmem_limit_bytes=vmem_limit,
            ),
        )(perm, x_flat)
        return out_flat.reshape(B, C, H, W)

    # ---- streaming two-pass path -------------------------------------------
    c_tile = _choose_c_tile(C, HW, itemsize, block_budget)
    n_ct = pl.cdiv(C, c_tile)

    cparams = pltpu.CompilerParams(
        dimension_semantics=("parallel", "parallel"),
        vmem_limit_bytes=vmem_limit,
    )

    stat_shape = jax.ShapeDtypeStruct((B, C, 1), jnp.float32)
    stat_spec = pl.BlockSpec((1, c_tile, 1), lambda b, ct: (b, ct, 0))
    x_spec = pl.BlockSpec((1, c_tile, HW), lambda b, ct: (b, ct, 0))

    # Pass 1: per-(b, c) statistics.
    mu, sig = pl.pallas_call(
        _stats_kernel,
        out_shape=(stat_shape, stat_shape),
        grid_spec=pltpu.PrefetchScalarGridSpec(
            num_scalar_prefetch=0,
            grid=(B, n_ct),
            in_specs=[x_spec],
            out_specs=[stat_spec, stat_spec],
        ),
        compiler_params=cparams,
    )(x_flat)

    # Tiny B*C pure-JAX op: fold normalize + permuted restyle into one affine.
    a = (sig[perm] / sig).astype(jnp.float32)          # (B, C, 1)
    bias = (mu[perm] - mu * a).astype(jnp.float32)     # (B, C, 1)

    # Pass 2: out = x * a + bias  (only 3 DMA streams per grid step).
    out_flat = pl.pallas_call(
        _normalize_kernel,
        out_shape=jax.ShapeDtypeStruct((B, C, HW), x.dtype),
        grid_spec=pltpu.PrefetchScalarGridSpec(
            num_scalar_prefetch=0,
            grid=(B, n_ct),
            in_specs=[x_spec, stat_spec, stat_spec],
            out_specs=x_spec,
        ),
        compiler_params=cparams,
    )(x_flat, a, bias)

    return out_flat.reshape(B, C, H, W)


def adain_reference(x, perm):
    """Pure-JAX reference reproducing the PyTorch forward semantics."""
    xf = x.astype(jnp.float32)
    mu = jnp.mean(xf, axis=(2, 3), keepdims=True)
    var = jnp.var(xf, axis=(2, 3), keepdims=True, ddof=1)  # torch.var: unbiased
    sig = jnp.sqrt(var + EPS)
    x_normed = (xf - mu) / sig
    return (x_normed * sig[perm] + mu[perm]).astype(x.dtype)


if __name__ == "__main__":
    # NOTE: AdaIN has no learned parameters; the p-gate (random.random() > p),
    # eval-mode passthrough and torch.randperm are host-side RNG / control
    # flow. Here we exercise the "training + mix applied" branch with a
    # deterministic non-identity permutation passed in.
    key = jax.random.PRNGKey(0)
    B, C, H, W = 2, 4, 16, 16
    x = jax.random.normal(key, (B, C, H, W), dtype=jnp.float32)
    perm = jnp.roll(jnp.arange(B), 1).astype(jnp.int32)   # deterministic swap

    ref = adain_reference(x, perm)

    # Fused single-pass path (default for this size).
    out_fused = jax.block_until_ready(adain_pallas(x, perm))
    assert out_fused.shape == (B, C, H, W)
    assert out_fused.dtype == x.dtype
    assert jnp.allclose(out_fused, ref, atol=1e-4, rtol=1e-4), "fused path mismatch"

    # Streaming two-pass path (forced, to validate both code paths).
    out_stream = jax.block_until_ready(adain_pallas(x, perm, force_streaming=True))
    assert jnp.allclose(out_stream, ref, atol=1e-4, rtol=1e-4), "streaming path mismatch"

    print("KERNEL_OK")
</pallas_src>

<mosaic_0001>
module attributes {stable_mosaic.version = 11 : i64} {
  func.func @_fused_kernel(%arg0: i32, %arg1: memref<2xi32, #tpu.memory_space<smem>>, %arg2: memref<2x4x256xf32, #tpu.memory_space<vmem>>, %arg3: memref<2x4x256xf32, #tpu.memory_space<vmem>>, %arg4: memref<2x4x1xf32, #tpu.memory_space<vmem>>, %arg5: memref<2x4x1xf32, #tpu.memory_space<vmem>>, %arg6: memref<2x4x1xf32, #tpu.memory_space<vmem>>) attributes {dimension_semantics = [#tpu.dimension_semantics<arbitrary>], iteration_bounds = array<i64: 1>, scalar_prefetch = 1 : i64, scratch_operands = 3 : i64, tpu.core_type = #tpu.core_type<tc>, window_params = [{pipeline_mode = #tpu.pipeline_mode<synchronous>, transform_indices = @transform_0, window_bounds = array<i64: 2, 4, 256>}, {pipeline_mode = #tpu.pipeline_mode<synchronous>, transform_indices = @transform_1, window_bounds = array<i64: 2, 4, 256>}]} {
    %c0_i32 = arith.constant 0 : i32
    %0 = arith.index_cast %c0_i32 : i32 to index
    %c0 = arith.constant 0 : index
    %c0_0 = arith.constant 0 : index
    %1 = vector.load %arg2[%0, %c0, %c0_0] : memref<2x4x256xf32, #tpu.memory_space<vmem>>, vector<1x4x256xf32>
    %2 = vector.shape_cast %1 : vector<1x4x256xf32> to vector<4x256xf32>
    %cst = arith.constant dense<0.000000e+00> : vector<4xf32>
    %3 = vector.multi_reduction <add>, %2, %cst [1] : vector<4x256xf32> to vector<4xf32>
    %4 = vector.shape_cast %3 : vector<4xf32> to vector<4x1xf32>
    %cst_1 = arith.constant 3.906250e-03 : f32
    %5 = vector.broadcast %cst_1 : f32 to vector<4x1xf32>
    %6 = arith.mulf %4, %5 : vector<4x1xf32>
    %7 = vector.broadcast %6 : vector<4x1xf32> to vector<4x256xf32>
    %8 = arith.subf %2, %7 : vector<4x256xf32>
    %9 = arith.mulf %8, %8 : vector<4x256xf32>
    %cst_2 = arith.constant dense<0.000000e+00> : vector<4xf32>
    %10 = vector.multi_reduction <add>, %9, %cst_2 [1] : vector<4x256xf32> to vector<4xf32>
    %11 = vector.shape_cast %10 : vector<4xf32> to vector<4x1xf32>
    %cst_3 = arith.constant 0.00392156886 : f32
    %12 = vector.broadcast %cst_3 : f32 to vector<4x1xf32>
    %13 = arith.mulf %11, %12 : vector<4x1xf32>
    %14 = arith.index_cast %c0_i32 : i32 to index
    %c0_4 = arith.constant 0 : index
    %c0_5 = arith.constant 0 : index
    %15 = vector.load %arg4[%14, %c0_4, %c0_5] : memref<2x4x1xf32, #tpu.memory_space<vmem>>, vector<1x4x1xf32>
    %16 = vector.shape_cast %15 : vector<1x4x1xf32> to vector<4x1xf32>
    %17 = vector.shape_cast %6 : vector<4x1xf32> to vector<1x4x1xf32>
    tpu.vector_store %arg4[%14, %c0_4, %c0_5], %17 {strides = array<i32>} : memref<2x4x1xf32, #tpu.memory_space<vmem>>, vector<1x4x1xf32>,
    %cst_6 = arith.constant 9.99999997E-7 : f32
    %18 = vector.broadcast %cst_6 : f32 to vector<4x1xf32>
    %19 = arith.addf %13, %18 : vector<4x1xf32>
    %20 = math.sqrt %19 : vector<4x1xf32>
    %21 = arith.index_cast %c0_i32 : i32 to index
    %c0_7 = arith.constant 0 : index
    %c0_8 = arith.constant 0 : index
    %22 = vector.load %arg5[%21, %c0_7, %c0_8] : memref<2x4x1xf32, #tpu.memory_space<vmem>>, vector<1x4x1xf32>
    %23 = vector.shape_cast %22 : vector<1x4x1xf32> to vector<4x1xf32>
    %24 = vector.shape_cast %20 : vector<4x1xf32> to vector<1x4x1xf32>
    tpu.vector_store %arg5[%21, %c0_7, %c0_8], %24 {strides = array<i32>} : memref<2x4x1xf32, #tpu.memory_space<vmem>>, vector<1x4x1xf32>,
    %cst_9 = arith.constant 9.99999997E-7 : f32
    %25 = vector.broadcast %cst_9 : f32 to vector<4x1xf32>
    %26 = arith.addf %13, %25 : vector<4x1xf32>
    %27 = math.rsqrt %26 : vector<4x1xf32>
    %28 = arith.index_cast %c0_i32 : i32 to index
    %c0_10 = arith.constant 0 : index
    %c0_11 = arith.constant 0 : index
    %29 = vector.load %arg6[%28, %c0_10, %c0_11] : memref<2x4x1xf32, #tpu.memory_space<vmem>>, vector<1x4x1xf32>
    %30 = vector.shape_cast %29 : vector<1x4x1xf32> to vector<4x1xf32>
    %31 = vector.shape_cast %27 : vector<4x1xf32> to vector<1x4x1xf32>
    tpu.vector_store %arg6[%28, %c0_10, %c0_11], %31 {strides = array<i32>} : memref<2x4x1xf32, #tpu.memory_space<vmem>>, vector<1x4x1xf32>,
    %c1_i32 = arith.constant 1 : i32
    %32 = arith.index_cast %c1_i32 : i32 to index
    %c0_12 = arith.constant 0 : index
    %c0_13 = arith.constant 0 : index
    %33 = vector.load %arg2[%32, %c0_12, %c0_13] : memref<2x4x256xf32, #tpu.memory_space<vmem>>, vector<1x4x256xf32>
    %34 = vector.shape_cast %33 : vector<1x4x256xf32> to vector<4x256xf32>
    %cst_14 = arith.constant dense<0.000000e+00> : vector<4xf32>
    %35 = vector.multi_reduction <add>, %34, %cst_14 [1] : vector<4x256xf32> to vector<4xf32>
    %36 = vector.shape_cast %35 : vector<4xf32> to vector<4x1xf32>
    %cst_15 = arith.constant 3.906250e-03 : f32
    %37 = vector.broadcast %cst_15 : f32 to vector<4x1xf32>
    %38 = arith.mulf %36, %37 : vector<4x1xf32>
    %39 = vector.broadcast %38 : vector<4x1xf32> to vector<4x256xf32>
    %40 = arith.subf %34, %39 : vector<4x256xf32>
    %41 = arith.mulf %40, %40 : vector<4x256xf32>
    %cst_16 = arith.constant dense<0.000000e+00> : vector<4xf32>
    %42 = vector.multi_reduction <add>, %41, %cst_16 [1] : vector<4x256xf32> to vector<4xf32>
    %43 = vector.shape_cast %42 : vector<4xf32> to vector<4x1xf32>
    %cst_17 = arith.constant 0.00392156886 : f32
    %44 = vector.broadcast %cst_17 : f32 to vector<4x1xf32>
    %45 = arith.mulf %43, %44 : vector<4x1xf32>
    %46 = arith.index_cast %c1_i32 : i32 to index
    %c0_18 = arith.constant 0 : index
    %c0_19 = arith.constant 0 : index
    %47 = vector.load %arg4[%46, %c0_18, %c0_19] : memref<2x4x1xf32, #tpu.memory_space<vmem>>, vector<1x4x1xf32>
    %48 = vector.shape_cast %47 : vector<1x4x1xf32> to vector<4x1xf32>
    %49 = vector.shape_cast %38 : vector<4x1xf32> to vector<1x4x1xf32>
    tpu.vector_store %arg4[%46, %c0_18, %c0_19], %49 {strides = array<i32>} : memref<2x4x1xf32, #tpu.memory_space<vmem>>, vector<1x4x1xf32>,
    %cst_20 = arith.constant 9.99999997E-7 : f32
    %50 = vector.broadcast %cst_20 : f32 to vector<4x1xf32>
    %51 = arith.addf %45, %50 : vector<4x1xf32>
    %52 = math.sqrt %51 : vector<4x1xf32>
    %53 = arith.index_cast %c1_i32 : i32 to index
    %c0_21 = arith.constant 0 : index
    %c0_22 = arith.constant 0 : index
    %54 = vector.load %arg5[%53, %c0_21, %c0_22] : memref<2x4x1xf32, #tpu.memory_space<vmem>>, vector<1x4x1xf32>
    %55 = vector.shape_cast %54 : vector<1x4x1xf32> to vector<4x1xf32>
    %56 = vector.shape_cast %52 : vector<4x1xf32> to vector<1x4x1xf32>
    tpu.vector_store %arg5[%53, %c0_21, %c0_22], %56 {strides = array<i32>} : memref<2x4x1xf32, #tpu.memory_space<vmem>>, vector<1x4x1xf32>,
    %cst_23 = arith.constant 9.99999997E-7 : f32
    %57 = vector.broadcast %cst_23 : f32 to vector<4x1xf32>
    %58 = arith.addf %45, %57 : vector<4x1xf32>
    %59 = math.rsqrt %58 : vector<4x1xf32>
    %60 = arith.index_cast %c1_i32 : i32 to index
    %c0_24 = arith.constant 0 : index
    %c0_25 = arith.constant 0 : index
    %61 = vector.load %arg6[%60, %c0_24, %c0_25] : memref<2x4x1xf32, #tpu.memory_space<vmem>>, vector<1x4x1xf32>
    %62 = vector.shape_cast %61 : vector<1x4x1xf32> to vector<4x1xf32>
    %63 = vector.shape_cast %59 : vector<4x1xf32> to vector<1x4x1xf32>
    tpu.vector_store %arg6[%60, %c0_24, %c0_25], %63 {strides = array<i32>} : memref<2x4x1xf32, #tpu.memory_space<vmem>>, vector<1x4x1xf32>,
    %c2_i32 = arith.constant 2 : i32
    %c0_i32_26 = arith.constant 0 : i32
    %64 = arith.index_cast %c0_i32_26 : i32 to index
    %65 = memref.load %arg1[%64] : memref<2xi32, #tpu.memory_space<smem>>
    %66 = arith.index_cast %65 : i32 to index
    %c0_27 = arith.constant 0 : index
    %c0_28 = arith.constant 0 : index
    %67 = vector.load %arg5[%66, %c0_27, %c0_28] : memref<2x4x1xf32, #tpu.memory_space<vmem>>, vector<1x4x1xf32>
    %68 = vector.shape_cast %67 : vector<1x4x1xf32> to vector<4x1xf32>
    %69 = arith.index_cast %c0_i32_26 : i32 to index
    %c0_29 = arith.constant 0 : index
    %c0_30 = arith.constant 0 : index
    %70 = vector.load %arg6[%69, %c0_29, %c0_30] : memref<2x4x1xf32, #tpu.memory_space<vmem>>, vector<1x4x1xf32>
    %71 = vector.shape_cast %70 : vector<1x4x1xf32> to vector<4x1xf32>
    %72 = arith.mulf %68, %71 : vector<4x1xf32>
    %73 = arith.index_cast %65 : i32 to index
    %c0_31 = arith.constant 0 : index
    %c0_32 = arith.constant 0 : index
    %74 = vector.load %arg4[%73, %c0_31, %c0_32] : memref<2x4x1xf32, #tpu.memory_space<vmem>>, vector<1x4x1xf32>
    %75 = vector.shape_cast %74 : vector<1x4x1xf32> to vector<4x1xf32>
    %76 = arith.index_cast %c0_i32_26 : i32 to index
    %c0_33 = arith.constant 0 : index
    %c0_34 = arith.constant 0 : index
    %77 = vector.load %arg4[%76, %c0_33, %c0_34] : memref<2x4x1xf32, #tpu.memory_space<vmem>>, vector<1x4x1xf32>
    %78 = vector.shape_cast %77 : vector<1x4x1xf32> to vector<4x1xf32>
    %79 = arith.mulf %78, %72 : vector<4x1xf32>
    %80 = arith.subf %75, %79 : vector<4x1xf32>
    %81 = arith.index_cast %c0_i32_26 : i32 to index
    %c0_35 = arith.constant 0 : index
    %c0_36 = arith.constant 0 : index
    %82 = vector.load %arg2[%81, %c0_35, %c0_36] : memref<2x4x256xf32, #tpu.memory_space<vmem>>, vector<1x4x256xf32>
    %83 = vector.shape_cast %82 : vector<1x4x256xf32> to vector<4x256xf32>
    %84 = vector.broadcast %72 : vector<4x1xf32> to vector<4x256xf32>
    %85 = arith.mulf %83, %84 : vector<4x256xf32>
    %86 = vector.broadcast %80 : vector<4x1xf32> to vector<4x256xf32>
    %87 = arith.addf %85, %86 : vector<4x256xf32>
    %88 = arith.index_cast %c0_i32_26 : i32 to index
    %c0_37 = arith.constant 0 : index
    %c0_38 = arith.constant 0 : index
    %89 = vector.load %arg3[%88, %c0_37, %c0_38] : memref<2x4x256xf32, #tpu.memory_space<vmem>>, vector<1x4x256xf32>
    %90 = vector.shape_cast %89 : vector<1x4x256xf32> to vector<4x256xf32>
    %91 = vector.shape_cast %87 : vector<4x256xf32> to vector<1x4x256xf32>
    tpu.vector_store %arg3[%88, %c0_37, %c0_38], %91 {strides = array<i32>} : memref<2x4x256xf32, #tpu.memory_space<vmem>>, vector<1x4x256xf32>,
    %c1_i32_39 = arith.constant 1 : i32
    %92 = arith.index_cast %c1_i32_39 : i32 to index
    %93 = memref.load %arg1[%92] : memref<2xi32, #tpu.memory_space<smem>>
    %94 = arith.index_cast %93 : i32 to index
    %c0_40 = arith.constant 0 : index
    %c0_41 = arith.constant 0 : index
    %95 = vector.load %arg5[%94, %c0_40, %c0_41] : memref<2x4x1xf32, #tpu.memory_space<vmem>>, vector<1x4x1xf32>
    %96 = vector.shape_cast %95 : vector<1x4x1xf32> to vector<4x1xf32>
    %97 = arith.index_cast %c1_i32_39 : i32 to index
    %c0_42 = arith.constant 0 : index
    %c0_43 = arith.constant 0 : index
    %98 = vector.load %arg6[%97, %c0_42, %c0_43] : memref<2x4x1xf32, #tpu.memory_space<vmem>>, vector<1x4x1xf32>
    %99 = vector.shape_cast %98 : vector<1x4x1xf32> to vector<4x1xf32>
    %100 = arith.mulf %96, %99 : vector<4x1xf32>
    %101 = arith.index_cast %93 : i32 to index
    %c0_44 = arith.constant 0 : index
    %c0_45 = arith.constant 0 : index
    %102 = vector.load %arg4[%101, %c0_44, %c0_45] : memref<2x4x1xf32, #tpu.memory_space<vmem>>, vector<1x4x1xf32>
    %103 = vector.shape_cast %102 : vector<1x4x1xf32> to vector<4x1xf32>
    %104 = arith.index_cast %c1_i32_39 : i32 to index
    %c0_46 = arith.constant 0 : index
    %c0_47 = arith.constant 0 : index
    %105 = vector.load %arg4[%104, %c0_46, %c0_47] : memref<2x4x1xf32, #tpu.memory_space<vmem>>, vector<1x4x1xf32>
    %106 = vector.shape_cast %105 : vector<1x4x1xf32> to vector<4x1xf32>
    %107 = arith.mulf %106, %100 : vector<4x1xf32>
    %108 = arith.subf %103, %107 : vector<4x1xf32>
    %109 = arith.index_cast %c1_i32_39 : i32 to index
    %c0_48 = arith.constant 0 : index
    %c0_49 = arith.constant 0 : index
    %110 = vector.load %arg2[%109, %c0_48, %c0_49] : memref<2x4x256xf32, #tpu.memory_space<vmem>>, vector<1x4x256xf32>
    %111 = vector.shape_cast %110 : vector<1x4x256xf32> to vector<4x256xf32>
    %112 = vector.broadcast %100 : vector<4x1xf32> to vector<4x256xf32>
    %113 = arith.mulf %111, %112 : vector<4x256xf32>
    %114 = vector.broadcast %108 : vector<4x1xf32> to vector<4x256xf32>
    %115 = arith.addf %113, %114 : vector<4x256xf32>
    %116 = arith.index_cast %c1_i32_39 : i32 to index
    %c0_50 = arith.constant 0 : index
    %c0_51 = arith.constant 0 : index
    %117 = vector.load %arg3[%116, %c0_50, %c0_51] : memref<2x4x256xf32, #tpu.memory_space<vmem>>, vector<1x4x256xf32>
    %118 = vector.shape_cast %117 : vector<1x4x256xf32> to vector<4x256xf32>
    %119 = vector.shape_cast %115 : vector<4x256xf32> to vector<1x4x256xf32>
    tpu.vector_store %arg3[%116, %c0_50, %c0_51], %119 {strides = array<i32>} : memref<2x4x256xf32, #tpu.memory_space<vmem>>, vector<1x4x256xf32>,
    %c2_i32_52 = arith.constant 2 : i32
    return
  }
  func.func @transform_0(%arg0: i32, %arg1: memref<2xi32, #tpu.memory_space<smem>>) -> (i32, i32, i32) {
    %c0_i32 = arith.constant 0 : i32
    %c0_i32_0 = arith.constant 0 : i32
    %c0_i32_1 = arith.constant 0 : i32
    %c0_i32_2 = arith.constant 0 : i32
    return %c0_i32, %c0_i32_0, %c0_i32_1 : i32, i32, i32
  }
  func.func @transform_1(%arg0: i32, %arg1: memref<2xi32, #tpu.memory_space<smem>>) -> (i32, i32, i32) {
    %c0_i32 = arith.constant 0 : i32
    %c0_i32_0 = arith.constant 0 : i32
    %c0_i32_1 = arith.constant 0 : i32
    %c0_i32_2 = arith.constant 0 : i32
    return %c0_i32, %c0_i32_0, %c0_i32_1 : i32, i32, i32
  }
}

</mosaic_0001>

<bundles_post_ra>
// kernel: tpu_custom_call.1
= control target key start
LH: loop header
LB: loop body
LE: loop exit
PB: predicated region body
PF: predicated region fallthrough
CT: control target
= control target key end

     0   :  { %s294_s9 = smov [#allocation6]   ;;  %s370_s0 = inlined_call_operand.hbm [shape: s32[2], index: 0, kind: input, shape index: {}]   ;;  %s371_s1 = inlined_call_operand.hbm [shape: f32[2,4,256], index: 1, kind: input, shape index: {}]   ;;  %s372_s2 = inlined_call_operand.hbm [shape: f32[2,4,256], index: 2, kind: output, shape index: {}]  }
   0x1   :  { %8 = dma.hbm_to_smem %s370_s0, 16, %s294_s9, [#allocation5] }
   0x2   :  { %288 = dma.done.wait [#allocation5], 16 }
   0x3   :  { %289 = vsyncadd [#allocation5], 4294967280 }
   0x4   :  { %10 = sfence }
   0x5   :  { %11 = vsyncpa [#allocation8], 0 }
   0x6   :  { %12 = vsyncpa [#allocation9], 0  ;;  %s295_s12 = smov [#allocation7]  }
   0x7   :  { %s18_s13 = sshll.u32 %s295_s12, 4  ;;  %s19_s13 = int_to_ptr.vmem [resolvable:$true] %s18_s13 }
   0x8   :  { %s256_s14 = scalar_lea.vmem %s19_s13, 256  ;;  %p261_p1 = scmp.lt.s32.totalorder %s19_s13, %s19_s13 }
   0x9   :  { %p257_p0 = scmp.ne.s32.totalorder %s19_s13, %s256_s14  ;;  %p262_p2 = scmp.lt.s32.totalorder %s256_s14, %s256_s14 }
   0xb   :  { %p263_p3 = por %p262_p2, %p261_p1 }
   0xd   :  { %p264_p4 = pnand %p263_p3, %p257_p0 }
   0xf   :  { %267 = shalt.err (!%p264_p4)
}
  0x10   :  { %s296_s15 = smov 128   ;;  %s297_s16 = smov 8  }
  0x11   :  { %24 = dma.hbm_to_vmem [thread:$0]  %s371_s1, 256, %s19_s13, [#allocation8], %s296_s15, %s296_s15, %s297_s16  }
  0x12   :  { %290 = dma.done.wait [#allocation8], 256  }
  0x13   :  { %291 = vsyncadd [#allocation8], 4294967040  ;;  %vm32_vm0 = vcmask 1043456   ;;  %v325_v0 = vld [vmem:[#allocation7] sm:$0xff]  ;;  %v327_v1 = vld [vmem:[#allocation7 + $0x8] sm:$0xff]  ;;  %v43_v12 = vlaneseq  ;;  %vm59_vm1 = vcmask 3072  }
  0x14   :  { %v30_v2 = vcombine.high %v325_v0, %v325_v0  ;;  %v33_v3 = vsel %vm32_vm0, %v325_v0, 0.0  ;;  %v75_v4 = vcombine.high %v327_v1, %v327_v1  ;;  %v77_v6 = vsel %vm32_vm0, %v327_v1, 0.0  ;;  %s352_s1 = sld [smem:[#allocation6 + $0x1]]  ;;  %s300_s25 = smov [#allocation10]  }
  0x15   :  { %v298_v10 = vmov 839922192   ;;  %v44_v14 = vshrl.u32 %v43_v12, 7  ;;  %v299_v34 = vmov 0   ;;  %s118_s18 = sld [smem:[#allocation6]]  ;;  %s202_s26 = sshll.u32 %s300_s25, 4  ;;  %s203_s26 = int_to_ptr.vmem [resolvable:$true] %s202_s26 }
  0x16   :  { %v34_v5 = vsel %vm32_vm0, %v30_v2, 0.0  ;;  %v78_v7 = vsel %vm32_vm0, %v75_v4, 0.0  ;;  %v41_v11 = vunpack.c.l.s4 %v298_v10  ;;  %233 = vset.pattern.permute.xlu1 %v299_v34  ;;  %232 = vset.pattern.permute.xlu0 %v299_v34  ;;  %s268_s27 = scalar_lea.vmem %s203_s26, 256  ;;  %p273_p6 = scmp.lt.s32.totalorder %s203_s26, %s203_s26 }
  0x17   :  { %v35_v8 = vadd.f32 %v34_v5, %v33_v3  ;;  %v79_v9 = vadd.f32 %v78_v7, %v77_v6  ;;  %p269_p5 = scmp.ne.s32.totalorder %s203_s26, %s268_s27  ;;  %p274_p7 = scmp.lt.s32.totalorder %s268_s27, %s268_s27 }
  0x18   :  { %v42_v13 = vunpack.c.0.s8 %v41_v11 }
  0x19   :  { %36 = vadd.xlane.f32.xlu0 %v35_v8  ;;  %p275_p8 = por %p274_p7, %p273_p6 }
  0x1a   :  { %v339_v15 = vsub.s32 %v42_v13, %v44_v14  ;;  %s224_s19 = sshll.u32 %s352_s1, 2 }
  0x1b   :  { %s222_s20 = sshll.u32 %s118_s18, 2  ;;  %s159_s21 = scalar_lea.vmem [#allocation3], %s224_s19 }
  0x1c   :  { %s120_s22 = scalar_lea.vmem [#allocation3], %s222_s20  ;;  %s124_s23 = scalar_lea.vmem [#allocation2], %s222_s20 }
  0x1d   :  { %80 = vadd.xlane.f32.xlu0 %v79_v9  ;;  %s163_s24 = scalar_lea.vmem [#allocation2], %s224_s19  ;;  %p276_p9 = pnand %p275_p8, %p269_p5 }
  0xa2   :  { %v37_v16 = vpop.xlane.xlu0 %36 }
  0xa3   :  { %v38_v17 = vmul.f32 0.00390625, %v37_v16 }
  0xa5   :  { %v46_v18 = vrot.slane %v38_v17, %v339_v15  ;;  %60 = vst.msk [vmem:[#allocation2] sm:$0xf] %vm59_vm1, %v38_v17 }
  0xa6   :  { %v81_v19 = vpop.xlane.xlu0 %80 }
  0xa7   :  { %v82_v20 = vmul.f32 0.00390625, %v81_v19  ;;  %v48_v21 = vsub.f32 %v325_v0, %v46_v18 }
  0xa9   :  { %v90_v22 = vrot.slane %v82_v20, %v339_v15  ;;  %104 = vst.msk [vmem:[#allocation2 + $0x4] sm:$0xf] %vm59_vm1, %v82_v20  ;;  %v49_v23 = vmul.f32 %v48_v21, %v48_v21 }
  0xab   :  { %v92_v24 = vsub.f32 %v327_v1, %v90_v22  ;;  %v51_v25 = vcombine.high %v49_v23, %v49_v23  ;;  %v53_v26 = vsel %vm32_vm0, %v49_v23, 0.0 }
  0xac   :  { %v126_v57 = vld [vmem:[#allocation2] sm:$0xf] }
  0xad   :  { %v54_v27 = vsel %vm32_vm0, %v51_v25, 0.0  ;;  %v93_v28 = vmul.f32 %v92_v24, %v92_v24 }
  0xae   :  { %v55_v29 = vadd.f32 %v54_v27, %v53_v26 }
  0xaf   :  { %v95_v30 = vcombine.high %v93_v28, %v93_v28  ;;  %v97_v31 = vsel %vm32_vm0, %v93_v28, 0.0 }
  0xb0   :  { %56 = vadd.xlane.f32.xlu1 %v55_v29  ;;  %v125_v59 = vld [vmem:[%s124_s23] sm:$0xf]  ;;  %v165_v60 = vld [vmem:[#allocation2 + $0x4] sm:$0xf] }
  0xb1   :  { %v98_v32 = vsel %vm32_vm0, %v95_v30, 0.0  ;;  %v164_v63 = vld [vmem:[%s163_s24] sm:$0xf] }
  0xb2   :  { %v99_v33 = vadd.f32 %v98_v32, %v97_v31 }
  0xb4   :  { %100 = vadd.xlane.f32.xlu1 %v99_v33 }
 0x139   :  { %v57_v35 = vpop.xlane.xlu1 %56 }
 0x13a   :  { %v58_v36 = vmul.f32 0.003921569, %v57_v35 }
 0x13c   :  { %v61_v37 = vadd.f32 1e-06, %v58_v36 }
 0x13d   :  { %v101_v38 = vpop.xlane.xlu1 %100 }
 0x13e   :  { %236 = vrsqrt.f32 %v61_v37  ;;  %v102_v39 = vmul.f32 0.003921569, %v101_v38  ;;  %vm64_vm2 = vcmp.eq.f32.partialorder %v61_v37, inf  ;;  %v67_v43 = vand.u32 2147483648, %v61_v37 }
 0x13f   :  { %vm66_vm3 = vcmp.eq.f32.partialorder %v61_v37, 0.0 }
 0x140   :  { %v105_v40 = vadd.f32 1e-06, %v102_v39 }
 0x142   :  { %238 = vrsqrt.f32 %v105_v40  ;;  %vm108_vm4 = vcmp.eq.f32.partialorder %v105_v40, inf  ;;  %v111_v48 = vand.u32 2147483648, %v105_v40  ;;  %vm110_vm5 = vcmp.eq.f32.partialorder %v105_v40, 0.0 }
 0x14b   :  { %v237_v41 = vpop.eup %236 }
 0x14c   :  { %v63_v42 = vmul.f32 %v237_v41, %v61_v37  ;;  %71 = vst.msk [vmem:[#allocation4] sm:$0xf] %vm59_vm1, %v237_v41 }
 0x14e   :  { %v65_v44 = vsel %vm64_vm2, %v61_v37, %v63_v42 }
 0x14f   :  { %v68_v45 = vsel %vm66_vm3, %v67_v43, %v65_v44  ;;  %v239_v46 = vpop.eup %238 }
 0x150   :  { %69 = vst.msk [vmem:[#allocation3] sm:$0xf] %vm59_vm1, %v68_v45  ;;  %v107_v47 = vmul.f32 %v239_v46, %v105_v40  ;;  %117 = vst.msk [vmem:[#allocation4 + $0x4] sm:$0xf] %vm59_vm1, %v239_v46 }
 0x152   :  { %v109_v49 = vsel %vm108_vm4, %v105_v40, %v107_v47 }
 0x153   :  { %v112_v50 = vsel %vm110_vm5, %v111_v48, %v109_v49  ;;  %v122_v51 = vld [vmem:[#allocation4] sm:$0xf] }
 0x154   :  { %114 = vst.msk [vmem:[#allocation3 + $0x4] sm:$0xf] %vm59_vm1, %v112_v50 }
 0x157   :  { %v161_v53 = vld [vmem:[#allocation4 + $0x4] sm:$0xf] }
 0x15b   :  { %v160_v52 = vld [vmem:[%s159_s21] sm:$0xf] }
 0x15c   :  { %v121_v54 = vld [vmem:[%s120_s22] sm:$0xf]  ;;  %v162_v55 = vmul.f32 %v161_v53, %v160_v52 }
 0x15d   :  { %v123_v56 = vmul.f32 %v122_v51, %v121_v54 }
 0x15e   :  { %171 = vperm.xlu1 %233, %v162_v55   ;;  %v166_v62 = vmul.f32 %v165_v60, %v162_v55 }
 0x15f   :  { %132 = vperm.xlu0 %232, %v123_v56   ;;  %v127_v58 = vmul.f32 %v126_v57, %v123_v56 }
 0x160   :  { %v167_v2 = vsub.f32 %v164_v63, %v166_v62 }
 0x161   :  { %v128_v61 = vsub.f32 %v125_v59, %v127_v58 }
 0x163   :  { %145 = vperm.xlu1 %233, %v128_v61  }
 0x167   :  { %184 = vperm.xlu1 %233, %v167_v2  }
 0x1d9   :  { %v172_v3 = vpop.permute.xlu1 %171 }
 0x1da   :  { %v133_v4 = vpop.permute.xlu0 %132  ;;  %v179_v7 = vrot.slane %v172_v3, %v339_v15 }
 0x1db   :  { %v140_v5 = vrot.slane %v133_v4, %v339_v15 }
 0x1dc   :  { %v181_v12 = vmul.f32 %v179_v7, %v327_v1 }
 0x1dd   :  { %v142_v8 = vmul.f32 %v140_v5, %v325_v0 }
 0x1de   :  { %v146_v6 = vpop.permute.xlu1 %145 }
 0x1df   :  { %v153_v9 = vrot.slane %v146_v6, %v339_v15 }
 0x1e1   :  { %v155_v10 = vadd.f32 %v153_v9, %v142_v8 }
 0x1e2   :  { %v185_v11 = vpop.permute.xlu1 %184 }
 0x1e3   :  { %156 = vst [vmem:[#allocation10] sm:$0xff] %v155_v10  ;;  %v192_v13 = vrot.slane %v185_v11, %v339_v15 }
 0x1e5   :  { %v194_v14 = vadd.f32 %v192_v13, %v181_v12 }
 0x1e7   :  { %196 = vst [vmem:[#allocation10 + $0x8] sm:$0xff] %v194_v14 }
 0x1e8   :  { %279 = shalt.err (!%p276_p9)
}
 0x1e9   :  { %208 = dma.vmem_to_hbm [thread:$0]  %s203_s26, 256, %s372_s2, [#allocation9], %s296_s15, %s296_s15, %s297_s16  }
 0x1ea   :  { %292 = dma.done.wait [#allocation9], 256  }
 0x1eb   :  { %293 = vsyncadd [#allocation9], 4294967040 }
 0x1ec   :  { %212 = vsyncpa [#allocation8], 1 }
 0x1ed   :  { %213 = vsyncpa [#allocation9], 1 }

</bundles_post_ra>
